<compile_context>
chip_gen: v5e
topology: v5e:2x2
jax: 0.10.0
libtpu: 0.0.40
codegen_flags: <defaults>
</compile_context>

<pallas_src>
import functools

import jax
import jax.numpy as jnp
from jax.experimental import pallas as pl
from jax.experimental.pallas import tpu as pltpu

HEAD_PAD = 128     # padded fused-head output width (lane-dense: one full vreg lane span)
BATCH_TILE = 8     # rows per grid step (multiple of the 8-sublane tile)


def actor_kernel(act_dim, obs_ref, w1_ref, b1_ref, w2_ref, b2_ref,
                 whead_ref, bhead_ref, out_ref):
    """One batch tile: two hidden layers + fused (mu | log_std | zero-pad) head."""
    # In-kernel bf16 cast of the activations (weights are already bf16).
    x = obs_ref[...].astype(jnp.bfloat16)                               # (bt, obs_dim)

    h1 = jnp.dot(x, w1_ref[...], preferred_element_type=jnp.float32)    # (bt, H) f32 acc
    h1 = jnp.maximum(h1 + b1_ref[...], 0.0)                             # bias+ReLU in f32
    h1 = h1.astype(jnp.bfloat16)

    h2 = jnp.dot(h1, w2_ref[...], preferred_element_type=jnp.float32)   # (bt, H) f32 acc
    h2 = jnp.maximum(h2 + b2_ref[...], 0.0)
    h2 = h2.astype(jnp.bfloat16)

    # Single fused head matmul -> lane-dense (bt, HEAD_PAD) slab.
    y = jnp.dot(h2, whead_ref[...], preferred_element_type=jnp.float32) + bhead_ref[...]

    # Clamp the log_std lanes. Pad lanes (>= 2*act_dim) are exactly zero because
    # whead/bhead are zero-padded in pack_actor_params and clip(0,-20,2)==0, so a single
    # `lane >= act_dim` predicate suffices; mu lanes pass through untouched.
    lane = jax.lax.broadcasted_iota(jnp.int32, y.shape, 1)
    y = jnp.where(lane >= act_dim, jnp.clip(y, -20.0, 2.0), y)

    out_ref[...] = y.astype(out_ref.dtype)


@functools.partial(jax.jit, static_argnames=("act_dim",))
def actor_forward(obs, w1, b1, w2, b2, whead, bhead, *, act_dim):
    """obs: (B, obs_dim) f32. Weights pre-packed via pack_actor_params (bf16, fused head).
    Returns (mu, log_std), each (B, act_dim) f32."""
    B, obs_dim = obs.shape
    head_pad = whead.shape[1]
    assert 2 * act_dim <= head_pad, "act_dim too large for packed head width"

    bt = BATCH_TILE
    B_pad = ((B + bt - 1) // bt) * bt
    if B_pad != B:  # pad batch to a whole number of tiles (sliced off below)
        obs = jnp.pad(obs, ((0, B_pad - B), (0, 0)))
    grid = (B_pad // bt,)

    const2d = lambda i: (0, 0)  # weights/biases: same block every grid step (stay resident)
    y = pl.pallas_call(
        functools.partial(actor_kernel, act_dim),
        out_shape=jax.ShapeDtypeStruct((B_pad, head_pad), jnp.float32),
        grid=grid,
        in_specs=[
            pl.BlockSpec((bt, obs_dim), lambda i: (i, 0)),   # obs tile per grid step
            pl.BlockSpec(w1.shape, const2d),
            pl.BlockSpec(b1.shape, const2d),
            pl.BlockSpec(w2.shape, const2d),
            pl.BlockSpec(b2.shape, const2d),
            pl.BlockSpec(whead.shape, const2d),
            pl.BlockSpec(bhead.shape, const2d),
        ],
        out_specs=pl.BlockSpec((bt, head_pad), lambda i: (i, 0)),
        compiler_params=pltpu.CompilerParams(dimension_semantics=("parallel",)),
    )(obs, w1, b1, w2, b2, whead, bhead)

    # Slices stay inside this jit, so no standalone tiny-array HBM round-trips.
    mu = y[:B, :act_dim]
    log_std = y[:B, act_dim:2 * act_dim]
    return mu, log_std


def init_actor_params(key, obs_dim, act_dim, hidden_dim):
    """PyTorch nn.Linear-style init: U(-1/sqrt(fan_in), 1/sqrt(fan_in)).
    Weights already transposed to (in, out); biases as (1, out). All f32."""
    def linear(k, fan_in, fan_out):
        kw, kb = jax.random.split(k)
        bound = 1.0 / jnp.sqrt(float(fan_in))
        w = jax.random.uniform(kw, (fan_in, fan_out), jnp.float32, -bound, bound)
        b = jax.random.uniform(kb, (1, fan_out), jnp.float32, -bound, bound)
        return w, b

    k1, k2, k3, k4 = jax.random.split(key, 4)
    w1, b1 = linear(k1, obs_dim, hidden_dim)
    w2, b2 = linear(k2, hidden_dim, hidden_dim)
    wmu, bmu = linear(k3, hidden_dim, act_dim)
    wls, bls = linear(k4, hidden_dim, act_dim)
    return w1, b1, w2, b2, wmu, bmu, wls, bls


def pack_actor_params(params, act_dim, head_pad=HEAD_PAD):
    """One-time packing (outside the per-call path): fuse + zero-pad head weights to
    head_pad lanes and cast matmul weights to bf16. Biases stay f32.
    NOTE: the in-kernel `lane >= act_dim` clamp and the wrapper slicing both rely on the
    pad lanes being exactly zero here."""
    w1, b1, w2, b2, wmu, bmu, wls, bls = params
    hidden_dim = w1.shape[1]
    assert 2 * act_dim <= head_pad

    whead = jnp.zeros((hidden_dim, head_pad), jnp.float32)
    whead = whead.at[:, :act_dim].set(wmu).at[:, act_dim:2 * act_dim].set(wls)
    bhead = jnp.zeros((1, head_pad), jnp.float32)
    bhead = bhead.at[:, :act_dim].set(bmu[0]).at[:, act_dim:2 * act_dim].set(bls[0])

    # TODO(synk): optional fp8 (v7x) / int8 (v5e/v6e) weight storage if weight DMA is
    # still exposed after the residency change; kept bf16 here for generation-portability.
    return (w1.astype(jnp.bfloat16), b1,
            w2.astype(jnp.bfloat16), b2,
            whead.astype(jnp.bfloat16), bhead)


def actor_forward_ref(obs, w1, b1, w2, b2, wmu, bmu, wls, bls):
    """Pure-JAX reference mirroring the kernel's precision path
    (bf16 matmul inputs, f32 accumulation, f32 elementwise tail)."""
    def mm(x, w):
        return jnp.dot(x.astype(jnp.bfloat16), w.astype(jnp.bfloat16),
                       preferred_element_type=jnp.float32)
    h1 = jnp.maximum(mm(obs, w1) + b1, 0.0)
    h2 = jnp.maximum(mm(h1, w2) + b2, 0.0)
    mu = mm(h2, wmu) + bmu
    log_std = jnp.clip(mm(h2, wls) + bls, -20.0, 2.0)
    return mu, log_std


if __name__ == "__main__":
    B, obs_dim, act_dim, hidden_dim = 8, 32, 8, 256

    key = jax.random.PRNGKey(0)
    k_obs, k_params = jax.random.split(key)

    obs = jax.random.normal(k_obs, (B, obs_dim), dtype=jnp.float32)
    params = init_actor_params(k_params, obs_dim, act_dim, hidden_dim)
    packed = pack_actor_params(params, act_dim)

    mu, log_std = actor_forward(obs, *packed, act_dim=act_dim)
    jax.block_until_ready((mu, log_std))

    mu_ref, log_std_ref = actor_forward_ref(obs, *params)
    assert mu.shape == (B, act_dim) and log_std.shape == (B, act_dim)
    assert jnp.allclose(mu, mu_ref, atol=1e-2, rtol=1e-2)
    assert jnp.allclose(log_std, log_std_ref, atol=1e-2, rtol=1e-2)
    assert float(jnp.max(log_std)) <= 2.0 and float(jnp.min(log_std)) >= -20.0

    # Also exercise a multi-tile batch (2 grid steps) to cover the gridded path.
    obs_big = jax.random.normal(k_obs, (2 * BATCH_TILE, obs_dim), dtype=jnp.float32)
    mu_b, ls_b = actor_forward(obs_big, *packed, act_dim=act_dim)
    jax.block_until_ready((mu_b, ls_b))
    mu_b_ref, ls_b_ref = actor_forward_ref(obs_big, *params)
    assert jnp.allclose(mu_b, mu_b_ref, atol=1e-2, rtol=1e-2)
    assert jnp.allclose(ls_b, ls_b_ref, atol=1e-2, rtol=1e-2)

    print("KERNEL_OK")
</pallas_src>

<mosaic_0001>
module attributes {stable_mosaic.version = 11 : i64} {
  func.func @actor_kernel(%arg0: i32, %arg1: memref<8x32xf32, #tpu.memory_space<vmem>>, %arg2: memref<32x256xbf16, #tpu.memory_space<vmem>>, %arg3: memref<1x256xf32, #tpu.memory_space<vmem>>, %arg4: memref<256x256xbf16, #tpu.memory_space<vmem>>, %arg5: memref<1x256xf32, #tpu.memory_space<vmem>>, %arg6: memref<256x128xbf16, #tpu.memory_space<vmem>>, %arg7: memref<1x128xf32, #tpu.memory_space<vmem>>, %arg8: memref<8x128xf32, #tpu.memory_space<vmem>>) attributes {dimension_semantics = [#tpu.dimension_semantics<parallel>], iteration_bounds = array<i64: 1>, scalar_prefetch = 0 : i64, scratch_operands = 0 : i64, tpu.core_type = #tpu.core_type<tc>, window_params = [{transform_indices = @transform_0, window_bounds = array<i64: 8, 32>}, {pipeline_mode = #tpu.pipeline_mode<synchronous>, transform_indices = @transform_1, window_bounds = array<i64: 32, 256>}, {pipeline_mode = #tpu.pipeline_mode<synchronous>, transform_indices = @transform_2, window_bounds = array<i64: 1, 256>}, {pipeline_mode = #tpu.pipeline_mode<synchronous>, transform_indices = @transform_3, window_bounds = array<i64: 256, 256>}, {pipeline_mode = #tpu.pipeline_mode<synchronous>, transform_indices = @transform_4, window_bounds = array<i64: 1, 256>}, {pipeline_mode = #tpu.pipeline_mode<synchronous>, transform_indices = @transform_5, window_bounds = array<i64: 256, 128>}, {pipeline_mode = #tpu.pipeline_mode<synchronous>, transform_indices = @transform_6, window_bounds = array<i64: 1, 128>}, {transform_indices = @transform_7, window_bounds = array<i64: 8, 128>}]} {
    %c0 = arith.constant 0 : index
    %c0_0 = arith.constant 0 : index
    %0 = vector.load %arg1[%c0, %c0_0] : memref<8x32xf32, #tpu.memory_space<vmem>>, vector<8x32xf32>
    %1 = arith.truncf %0 : vector<8x32xf32> to vector<8x32xbf16>
    %c0_1 = arith.constant 0 : index
    %c0_2 = arith.constant 0 : index
    %2 = vector.load %arg2[%c0_1, %c0_2] : memref<32x256xbf16, #tpu.memory_space<vmem>>, vector<32x256xbf16>
    %cst = arith.constant dense<0.000000e+00> : vector<8x256xf32>
    %3 = tpu.matmul %1, %2, %cst {dimension_numbers = #tpu.dot_dimension_numbers<[1], [0], [0], [1], [0, 0, 1, 1], [], []>} : vector<8x32xbf16>, vector<32x256xbf16>, vector<8x256xf32> -> vector<8x256xf32>
    %c0_3 = arith.constant 0 : index
    %c0_4 = arith.constant 0 : index
    %4 = vector.load %arg3[%c0_3, %c0_4] : memref<1x256xf32, #tpu.memory_space<vmem>>, vector<1x256xf32>
    %5 = vector.broadcast %4 : vector<1x256xf32> to vector<8x256xf32>
    %6 = arith.addf %3, %5 : vector<8x256xf32>
    %cst_5 = arith.constant 0.000000e+00 : f32
    %7 = vector.broadcast %cst_5 : f32 to vector<8x256xf32>
    %8 = arith.maximumf %6, %7 : vector<8x256xf32>
    %9 = arith.truncf %8 : vector<8x256xf32> to vector<8x256xbf16>
    %c0_6 = arith.constant 0 : index
    %c0_7 = arith.constant 0 : index
    %10 = vector.load %arg4[%c0_6, %c0_7] : memref<256x256xbf16, #tpu.memory_space<vmem>>, vector<256x256xbf16>
    %cst_8 = arith.constant dense<0.000000e+00> : vector<8x256xf32>
    %11 = tpu.matmul %9, %10, %cst_8 {dimension_numbers = #tpu.dot_dimension_numbers<[1], [0], [0], [1], [0, 0, 1, 1], [], []>} : vector<8x256xbf16>, vector<256x256xbf16>, vector<8x256xf32> -> vector<8x256xf32>
    %c0_9 = arith.constant 0 : index
    %c0_10 = arith.constant 0 : index
    %12 = vector.load %arg5[%c0_9, %c0_10] : memref<1x256xf32, #tpu.memory_space<vmem>>, vector<1x256xf32>
    %13 = vector.broadcast %12 : vector<1x256xf32> to vector<8x256xf32>
    %14 = arith.addf %11, %13 : vector<8x256xf32>
    %cst_11 = arith.constant 0.000000e+00 : f32
    %15 = vector.broadcast %cst_11 : f32 to vector<8x256xf32>
    %16 = arith.maximumf %14, %15 : vector<8x256xf32>
    %17 = arith.truncf %16 : vector<8x256xf32> to vector<8x256xbf16>
    %c0_12 = arith.constant 0 : index
    %c0_13 = arith.constant 0 : index
    %18 = vector.load %arg6[%c0_12, %c0_13] : memref<256x128xbf16, #tpu.memory_space<vmem>>, vector<256x128xbf16>
    %cst_14 = arith.constant dense<0.000000e+00> : vector<8x128xf32>
    %19 = tpu.matmul %17, %18, %cst_14 {dimension_numbers = #tpu.dot_dimension_numbers<[1], [0], [0], [1], [0, 0, 1, 1], [], []>} : vector<8x256xbf16>, vector<256x128xbf16>, vector<8x128xf32> -> vector<8x128xf32>
    %c0_15 = arith.constant 0 : index
    %c0_16 = arith.constant 0 : index
    %20 = vector.load %arg7[%c0_15, %c0_16] : memref<1x128xf32, #tpu.memory_space<vmem>>, vector<1x128xf32>
    %21 = vector.broadcast %20 : vector<1x128xf32> to vector<8x128xf32>
    %22 = arith.addf %19, %21 : vector<8x128xf32>
    %23 = tpu.iota {dimensions = array<i32: 1>} : vector<8x128xi32>
    %c8_i32 = arith.constant 8 : i32
    %24 = vector.broadcast %c8_i32 : i32 to vector<8x128xi32>
    %25 = arith.cmpi sge, %23, %24 : vector<8x128xi32>
    %cst_17 = arith.constant -2.000000e+01 : f32
    %cst_18 = arith.constant 2.000000e+00 : f32
    %26 = vector.broadcast %cst_17 : f32 to vector<8x128xf32>
    %27 = arith.maximumf %26, %22 : vector<8x128xf32>
    %28 = vector.broadcast %cst_18 : f32 to vector<8x128xf32>
    %29 = arith.minimumf %28, %27 : vector<8x128xf32>
    %30 = arith.select %25, %29, %22 : vector<8x128xi1>, vector<8x128xf32>
    %c0_19 = arith.constant 0 : index
    %c0_20 = arith.constant 0 : index
    %31 = vector.load %arg8[%c0_19, %c0_20] : memref<8x128xf32, #tpu.memory_space<vmem>>, vector<8x128xf32>
    tpu.vector_store %arg8[%c0_19, %c0_20], %30 {strides = array<i32>} : memref<8x128xf32, #tpu.memory_space<vmem>>, vector<8x128xf32>,
    return
  }
  func.func @transform_0(%arg0: i32) -> (i32, i32) {
    %c0_i32 = arith.constant 0 : i32
    %c0_i32_0 = arith.constant 0 : i32
    return %arg0, %c0_i32 : i32, i32
  }
  func.func @transform_1(%arg0: i32) -> (i32, i32) {
    %c0_i32 = arith.constant 0 : i32
    %c0_i32_0 = arith.constant 0 : i32
    %c0_i32_1 = arith.constant 0 : i32
    return %c0_i32, %c0_i32_0 : i32, i32
  }
  func.func @transform_2(%arg0: i32) -> (i32, i32) {
    %c0_i32 = arith.constant 0 : i32
    %c0_i32_0 = arith.constant 0 : i32
    %c0_i32_1 = arith.constant 0 : i32
    return %c0_i32, %c0_i32_0 : i32, i32
  }
  func.func @transform_3(%arg0: i32) -> (i32, i32) {
    %c0_i32 = arith.constant 0 : i32
    %c0_i32_0 = arith.constant 0 : i32
    %c0_i32_1 = arith.constant 0 : i32
    return %c0_i32, %c0_i32_0 : i32, i32
  }
  func.func @transform_4(%arg0: i32) -> (i32, i32) {
    %c0_i32 = arith.constant 0 : i32
    %c0_i32_0 = arith.constant 0 : i32
    %c0_i32_1 = arith.constant 0 : i32
    return %c0_i32, %c0_i32_0 : i32, i32
  }
  func.func @transform_5(%arg0: i32) -> (i32, i32) {
    %c0_i32 = arith.constant 0 : i32
    %c0_i32_0 = arith.constant 0 : i32
    %c0_i32_1 = arith.constant 0 : i32
    return %c0_i32, %c0_i32_0 : i32, i32
  }
  func.func @transform_6(%arg0: i32) -> (i32, i32) {
    %c0_i32 = arith.constant 0 : i32
    %c0_i32_0 = arith.constant 0 : i32
    %c0_i32_1 = arith.constant 0 : i32
    return %c0_i32, %c0_i32_0 : i32, i32
  }
  func.func @transform_7(%arg0: i32) -> (i32, i32) {
    %c0_i32 = arith.constant 0 : i32
    %c0_i32_0 = arith.constant 0 : i32
    return %arg0, %c0_i32 : i32, i32
  }
}

</mosaic_0001>

<bundles_post_ra>
// kernel: actor_forward.1
= control target key start
LH: loop header
LB: loop body
LE: loop exit
PB: predicated region body
PF: predicated region fallthrough
CT: control target
= control target key end

     0   :  { %12 = vsyncpa [#allocation3], 0  ;;  %s1066_s0 = inlined_call_operand.hbm [shape: f32[8,32], index: 0, kind: input, shape index: {}]   ;;  %s1067_s1 = inlined_call_operand.hbm [shape: bf16[32,256], index: 1, kind: input, shape index: {}]   ;;  %s1068_s2 = inlined_call_operand.hbm [shape: f32[1,256], index: 2, kind: input, shape index: {}]   ;;  %s1069_s3 = inlined_call_operand.hbm [shape: bf16[256,256], index: 3, kind: input, shape index: {}]   ;;  %s1070_s4 = inlined_call_operand.vmem [shape: f32[1,256], index: 4, kind: input, shape index: {}]   ;;  %s1071_s5 = inlined_call_operand.hbm [shape: bf16[256,128], index: 5, kind: input, shape index: {}]   ;;  %s1072_s6 = inlined_call_operand.vmem [shape: f32[1,128], index: 6, kind: input, shape index: {}]   ;;  %s1073_s7 = inlined_call_operand.vmem [shape: f32[8,128], index: 7, kind: output, shape index: {}]  }
   0x1   :  { %13 = vsyncpa [#allocation5], 0  ;;  %s30_s26 = sshll.u32 %s1067_s1, 4  ;;  %s31_s26 = int_to_ptr.hbm [resolvable:$true] %s30_s26 }
   0x2   :  { %14 = vsyncpa [#allocation8], 0  ;;  %s991_s27 = smov [#allocation4]   ;;  %s54_s8 = sshll.u32 %s1069_s3, 4  ;;  %s55_s8 = int_to_ptr.hbm [resolvable:$true] %s54_s8 }
   0x3   :  { %s32_s28 = sshll.u32 %s991_s27, 4  ;;  %s992_s9 = smov 128   ;;  %s33_s28 = int_to_ptr.vmem [resolvable:$true] %s32_s28 }
   0x4   :  { %s993_s10 = smov 8   ;;  %s994_s11 = smov [#allocation7]  }
   0x5   :  { %38 = dma.hbm_to_vmem [thread:$0]  %s31_s26, 512, %s33_s28, [#allocation5], %s992_s9, %s992_s9, %s993_s10  }
   0x6   :  { %s56_s12 = sshll.u32 %s994_s11, 4  ;;  %s20_s15 = sshll.u32 %s1066_s0, 4  ;;  %s57_s12 = int_to_ptr.vmem [resolvable:$true] %s56_s12  ;;  %s21_s15 = int_to_ptr.hbm [resolvable:$true] %s20_s15 }
   0x7   :  { %62 = dma.hbm_to_vmem [thread:$0]  %s55_s8, 4096, %s57_s12, [#allocation8], %s992_s9, %s992_s9, %s993_s10  }
   0x8   :  { %s44_s17 = sshll.u32 %s1068_s2, 4  ;;  %s995_s18 = smov [#allocation2]   ;;  %s45_s17 = int_to_ptr.hbm [resolvable:$true] %s44_s17 }
   0x9   :  { %s22_s19 = sshll.u32 %s995_s18, 4  ;;  %s996_s3 = smov [#allocation6]   ;;  %s23_s19 = int_to_ptr.vmem [resolvable:$true] %s22_s19 }
   0xa   :  { %25 = dma.hbm_to_vmem [thread:$0]  %s21_s15, 128, %s23_s19, [#allocation3]  }
   0xb   :  { %s46_s20 = sshll.u32 %s996_s3, 4  ;;  %s69_s23 = sshll.u32 %s1071_s5, 4  ;;  %s47_s20 = int_to_ptr.vmem [resolvable:$true] %s46_s20  ;;  %s70_s23 = int_to_ptr.hbm [resolvable:$true] %s69_s23 }
   0xc   :  { %49 = dma.hbm_to_vmem [thread:$0]  %s45_s17, 32, %s47_s20, [#allocation5]  }
   0xd   :  { %s997_s0 = smov [#allocation9]   ;;  %s998_s25 = smov 64  }
   0xe   :  { %s71_s24 = sshll.u32 %s997_s0, 4  ;;  %s999_s26 = smov 4   ;;  %s72_s24 = int_to_ptr.vmem [resolvable:$true] %s71_s24 }
   0xf   :  { %77 = dma.hbm_to_vmem [thread:$0]  %s70_s23, 2048, %s72_s24, [#allocation8], %s998_s25, %s998_s25, %s999_s26  }
  0x10   :  { %985 = dma.done.wait [#allocation3], 128  }
  0x11   :  { %986 = vsyncadd [#allocation3], 4294967168 }
  0x12   :  { %987 = dma.done.wait [#allocation5], 544  }
  0x13   :  { %988 = vsyncadd [#allocation5], 4294966752 }
  0x14   :  { %989 = dma.done.wait [#allocation8], 6144  }
  0x15   :  { %990 = vsyncadd [#allocation8], 4294961152  ;;  %v603_v0 = vld [vmem:[#allocation4 + $0x10] sm:$0xf]  ;;  %v806_v1 = vld [vmem:[#allocation4 + $0x14] sm:$0xf0] }
  0x16   :  { %v805_v2 = vld [vmem:[#allocation4 + $0x14] sm:$0xf]  ;;  %v604_v3 = vor.u32 %v806_v1, %v603_v0  ;;  %v605_v4 = vld [vmem:[#allocation4 + $0x18] sm:$0xf0]  ;;  %v595_v5 = vld [vmem:[#allocation4] sm:$0xf] }
  0x17   :  { %v804_v6 = vld [vmem:[#allocation4 + $0x4] sm:$0xf0]  ;;  %v608_v7 = vor.u32 %v805_v2, %v605_v4  ;;  %v803_v8 = vld [vmem:[#allocation4 + $0x4] sm:$0xf]  ;;  %v597_v9 = vld [vmem:[#allocation4 + $0x8] sm:$0xf0] }
  0x18   :  { %v101_v10 = vld [vmem:[#allocation2] sm:$0xff]  ;;  %vm133_vm0 = vcmask 261120   ;;  %143 = vmatpush.bf16.msra.mxu0 %v604_v3  ;;  %v596_v11 = vor.u32 %v804_v6, %v595_v5  ;;  %v669_v12 = vld [vmem:[#allocation7 + $0x70] sm:$0xf]  ;;  %v600_v15 = vor.u32 %v803_v8, %v597_v9  ;;  %v661_v24 = vld [vmem:[#allocation7 + $0x60] sm:$0xf] }
  0x19   :  { %v822_v13 = vld [vmem:[#allocation7 + $0x74] sm:$0xf0]  ;;  %v733_v14 = vld [vmem:[#allocation7 + $0xf0] sm:$0xf]  ;;  %156 = vmatpush.bf16.msra.mxu1 %v608_v7  ;;  %v821_v18 = vld [vmem:[#allocation7 + $0x74] sm:$0xf]  ;;  %v102_v25 = vpack.c.bf16 %v101_v10, %v101_v10 }
  0x1a   :  { %v670_v16 = vor.u32 %v822_v13, %v669_v12  ;;  %v838_v17 = vld [vmem:[#allocation7 + $0xf4] sm:$0xf0]  ;;  %v671_v19 = vld [vmem:[#allocation7 + $0x78] sm:$0xf0]  ;;  %v837_v22 = vld [vmem:[#allocation7 + $0xf4] sm:$0xf] }
  0x1b   :  { %v734_v20 = vor.u32 %v838_v17, %v733_v14  ;;  %v674_v21 = vor.u32 %v821_v18, %v671_v19  ;;  %v735_v23 = vld [vmem:[#allocation7 + $0xf8] sm:$0xf0]  ;;  %v820_v27 = vld [vmem:[#allocation7 + $0x64] sm:$0xf0]  ;;  %v725_v28 = vld [vmem:[#allocation7 + $0xe0] sm:$0xf] }
  0x1c   :  { %365 = vmatpush.bf16.msra.mxu2 %v670_v16  ;;  %v738_v26 = vor.u32 %v837_v22, %v735_v23  ;;  %v836_v29 = vld [vmem:[#allocation7 + $0xe4] sm:$0xf0]  ;;  %144 = vmatpush.bf16.msra.mxu0 %v596_v11  ;;  %v662_v30 = vor.u32 %v820_v27, %v661_v24  ;;  %v819_v32 = vld [vmem:[#allocation7 + $0x64] sm:$0xf]  ;;  %v663_v33 = vld [vmem:[#allocation7 + $0x68] sm:$0xf0] }
  0x1d   :  { %378 = vmatpush.bf16.msra.mxu3 %v734_v20  ;;  %v726_v31 = vor.u32 %v836_v29, %v725_v28  ;;  %v835_v34 = vld [vmem:[#allocation7 + $0xe4] sm:$0xf]  ;;  %157 = vmatpush.bf16.msra.mxu1 %v600_v15  ;;  %v666_v35 = vor.u32 %v819_v32, %v663_v33  ;;  %v727_v36 = vld [vmem:[#allocation7 + $0xe8] sm:$0xf0]  ;;  %v653_v37 = vld [vmem:[#allocation7 + $0x50] sm:$0xf] }
  0x1e   :  { %v818_v38 = vld [vmem:[#allocation7 + $0x54] sm:$0xf0]  ;;  %v730_v39 = vor.u32 %v835_v34, %v727_v36  ;;  %v717_v40 = vld [vmem:[#allocation7 + $0xd0] sm:$0xf]  ;;  %v817_v42 = vld [vmem:[#allocation7 + $0x54] sm:$0xf] }
  0x1f   :  { %v834_v41 = vld [vmem:[#allocation7 + $0xd4] sm:$0xf0]  ;;  %609 = vmatmul.msk.bf16.vlgmr.msra.gmra.mxu0 %vm133_vm0, %v102_v25  ;;  %v654_v43 = vor.u32 %v818_v38, %v653_v37  ;;  %v655_v44 = vld [vmem:[#allocation7 + $0x58] sm:$0xf0]  ;;  %v833_v45 = vld [vmem:[#allocation7 + $0xd4] sm:$0xf] }
  0x20   :  { %391 = vmatpush.bf16.msrb.mxu0 %v674_v21  ;;  %366 = vmatpush.bf16.msra.mxu2 %v662_v30  ;;  %v719_v46 = vld [vmem:[#allocation7 + $0xd8] sm:$0xf0]  ;;  %v718_v47 = vor.u32 %v834_v41, %v717_v40  ;;  %v645_v48 = vld [vmem:[#allocation7 + $0x40] sm:$0xf]  ;;  %v816_v49 = vld [vmem:[#allocation7 + $0x44] sm:$0xf0]  ;;  %v658_v50 = vor.u32 %v817_v42, %v655_v44 }
  0x21   :  { %404 = vmatpush.bf16.msrb.mxu1 %v738_v26  ;;  %379 = vmatpush.bf16.msra.mxu3 %v726_v31  ;;  %v709_v51 = vld [vmem:[#allocation7 + $0xc0] sm:$0xf]  ;;  %v832_v52 = vld [vmem:[#allocation7 + $0xc4] sm:$0xf0]  ;;  %v722_v53 = vor.u32 %v833_v45, %v719_v46  ;;  %v815_v54 = vld [vmem:[#allocation7 + $0x44] sm:$0xf]  ;;  %v646_v56 = vor.u32 %v816_v49, %v645_v48 }
  0x22   :  { %610 = vmatmul.msk.bf16.vlgmr.msra.gmra.mxu1 %vm133_vm0, %v102_v25  ;;  %v647_v55 = vld [vmem:[#allocation7 + $0x48] sm:$0xf0]  ;;  %v831_v57 = vld [vmem:[#allocation7 + $0xc4] sm:$0xf]  ;;  %v710_v59 = vor.u32 %v832_v52, %v709_v51  ;;  %v637_v60 = vld [vmem:[#allocation7 + $0x30] sm:$0xf] }
  0x23   :  { %v711_v58 = vld [vmem:[#allocation7 + $0xc8] sm:$0xf0]  ;;  %v814_v61 = vld [vmem:[#allocation7 + $0x34] sm:$0xf0]  ;;  %v650_v62 = vor.u32 %v815_v54, %v647_v55  ;;  %v701_v63 = vld [vmem:[#allocation7 + $0xb0] sm:$0xf] }
  0x24   :  { %392 = vmatpush.bf16.msrb.mxu0 %v666_v35  ;;  %367 = vmatpush.bf16.msra.mxu2 %v654_v43  ;;  %v830_v0 = vld [vmem:[#allocation7 + $0xb4] sm:$0xf0]  ;;  %v714_v1 = vor.u32 %v831_v57, %v711_v58  ;;  %v813_v2 = vld [vmem:[#allocation7 + $0x34] sm:$0xf]  ;;  %v639_v3 = vld [vmem:[#allocation7 + $0x38] sm:$0xf0]  ;;  %v638_v4 = vor.u32 %v814_v61, %v637_v60 }
  0x25   :  { %405 = vmatpush.bf16.msrb.mxu1 %v730_v39  ;;  %380 = vmatpush.bf16.msra.mxu3 %v718_v47  ;;  %v829_v5 = vld [vmem:[#allocation7 + $0xb4] sm:$0xf]  ;;  %v703_v6 = vld [vmem:[#allocation7 + $0xb8] sm:$0xf0]  ;;  %v702_v7 = vor.u32 %v830_v0, %v701_v63  ;;  %v629_v8 = vld [vmem:[#allocation7 + $0x20] sm:$0xf]  ;;  %v642_v10 = vor.u32 %v813_v2, %v639_v3 }
  0x26   :  { %v812_v9 = vld [vmem:[#allocation7 + $0x24] sm:$0xf0]  ;;  %v693_v11 = vld [vmem:[#allocation7 + $0xa0] sm:$0xf]  ;;  %v706_v13 = vor.u32 %v829_v5, %v703_v6  ;;  %v811_v14 = vld [vmem:[#allocation7 + $0x24] sm:$0xf] }
  0x27   :  { %v828_v12 = vld [vmem:[#allocation7 + $0xa4] sm:$0xf0]  ;;  %v631_v15 = vld [vmem:[#allocation7 + $0x28] sm:$0xf0]  ;;  %v630_v16 = vor.u32 %v812_v9, %v629_v8  ;;  %v827_v17 = vld [vmem:[#allocation7 + $0xa4] sm:$0xf] }
  0x28   :  { %393 = vmatpush.bf16.msrb.mxu0 %v658_v50  ;;  %368 = vmatpush.bf16.msra.mxu2 %v646_v56  ;;  %v695_v18 = vld [vmem:[#allocation7 + $0xa8] sm:$0xf0]  ;;  %v694_v19 = vor.u32 %v828_v12, %v693_v11  ;;  %v634_v20 = vor.u32 %v811_v14, %v631_v15  ;;  %v621_v22 = vld [vmem:[#allocation7 + $0x10] sm:$0xf]  ;;  %v810_v23 = vld [vmem:[#allocation7 + $0x14] sm:$0xf0] }
  0x29   :  { %406 = vmatpush.bf16.msrb.mxu1 %v722_v53  ;;  %381 = vmatpush.bf16.msra.mxu3 %v710_v59  ;;  %v698_v21 = vor.u32 %v827_v17, %v695_v18  ;;  %v685_v24 = vld [vmem:[#allocation7 + $0x90] sm:$0xf]  ;;  %v622_v25 = vor.u32 %v810_v23, %v621_v22  ;;  %v826_v26 = vld [vmem:[#allocation7 + $0x94] sm:$0xf0]  ;;  %v809_v27 = vld [vmem:[#allocation7 + $0x14] sm:$0xf] }
  0x2a   :  { %v623_v28 = vld [vmem:[#allocation7 + $0x18] sm:$0xf0]  ;;  %v686_v29 = vor.u32 %v826_v26, %v685_v24  ;;  %v825_v31 = vld [vmem:[#allocation7 + $0x94] sm:$0xf]  ;;  %v613_v34 = vld [vmem:[#allocation7] sm:$0xf] }
  0x2b   :  { %v626_v30 = vor.u32 %v809_v27, %v623_v28  ;;  %v687_v32 = vld [vmem:[#allocation7 + $0x98] sm:$0xf0]  ;;  %v808_v35 = vld [vmem:[#allocation7 + $0x4] sm:$0xf0]  ;;  %v677_v36 = vld [vmem:[#allocation7 + $0x80] sm:$0xf] }
  0x2c   :  { %394 = vmatpush.bf16.msrb.mxu0 %v650_v62  ;;  %369 = vmatpush.bf16.msra.mxu2 %v638_v4  ;;  %v690_v33 = vor.u32 %v825_v31, %v687_v32  ;;  %v614_v37 = vor.u32 %v808_v35, %v613_v34  ;;  %v824_v38 = vld [vmem:[#allocation7 + $0x84] sm:$0xf0]  ;;  %v807_v39 = vld [vmem:[#allocation7 + $0x4] sm:$0xf]  ;;  %v615_v40 = vld [vmem:[#allocation7 + $0x8] sm:$0xf0]  ;;  %v579_v32 = vlaneseq }
  0x2d   :  { %407 = vmatpush.bf16.msrb.mxu1 %v714_v1  ;;  %382 = vmatpush.bf16.msra.mxu3 %v702_v7  ;;  %v678_v41 = vor.u32 %v824_v38, %v677_v36  ;;  %v618_v42 = vor.u32 %v807_v39, %v615_v40  ;;  %v823_v43 = vld [vmem:[#allocation7 + $0x84] sm:$0xf]  ;;  %v679_v44 = vld [vmem:[#allocation7 + $0x88] sm:$0xf0]  ;;  %v854_v46 = vld [vmem:[#allocation9 + $0x78] sm:$0xff] }
  0x2e   :  { %v682_v45 = vor.u32 %v823_v43, %v679_v44  ;;  %v846_v47 = vld [vmem:[#allocation9 + $0x38] sm:$0xff]  ;;  %v853_v48 = vld [vmem:[#allocation9 + $0x70] sm:$0xff]  ;;  %v852_v50 = vld [vmem:[#allocation9 + $0x68] sm:$0xff]  ;;  %v580_v35 = vand.u32 127, %v579_v32 }
  0x2f   :  { %v845_v49 = vld [vmem:[#allocation9 + $0x30] sm:$0xff]  ;;  %v844_v51 = vld [vmem:[#allocation9 + $0x28] sm:$0xff]  ;;  %v851_v52 = vld [vmem:[#allocation9 + $0x60] sm:$0xff] }
  0x30   :  { %395 = vmatpush.bf16.msrb.mxu0 %v642_v10  ;;  %370 = vmatpush.bf16.msra.mxu2 %v630_v16  ;;  %v843_v53 = vld [vmem:[#allocation9 + $0x20] sm:$0xff]  ;;  %v850_v54 = vld [vmem:[#allocation9 + $0x58] sm:$0xff]  ;;  %v849_v56 = vld [vmem:[#allocation9 + $0x50] sm:$0xff]  ;;  %vm581_vm1 = vcmp.ge.s32.totalorder %v580_v35, 8 }
  0x31   :  { %408 = vmatpush.bf16.msrb.mxu1 %v706_v13  ;;  %383 = vmatpush.bf16.msra.mxu3 %v694_v19  ;;  %v107_v55 = vld [vmem:[#allocation6] sm:$0x3]  ;;  %v848_v6 = vld [vmem:[#allocation9 + $0x48] sm:$0xff]  ;;  %v841_v7 = vld [vmem:[#allocation9 + $0x10] sm:$0xff] }
  0x32   :  { %v109_v57 = vperm.slane %v107_v55, 0  ;;  %v110_v58 = vperm.slane %v107_v55, 1  ;;  %v842_v5 = vld [vmem:[#allocation9 + $0x18] sm:$0xff]  ;;  %v847_v8 = vld [vmem:[#allocation9 + $0x40] sm:$0xff]  ;;  %v840_v9 = vld [vmem:[#allocation9 + $0x8] sm:$0xff] }
  0x33   :  { %v839_v10 = vld [vmem:[#allocation9] sm:$0xff]  ;;  %v199_v11 = vld [vmem:[%s1070_s4] sm:$0x3] }
  0x34   :  { %396 = vmatpush.bf16.msrb.mxu0 %v634_v20  ;;  %371 = vmatpush.bf16.msra.mxu2 %v622_v25  ;;  %v202_v12 = vperm.slane %v199_v11, 1  ;;  %v201_v17 = vperm.slane %v199_v11, 0  ;;  %v864_v31 = vld [vmem:[%s1072_s6] ss:$0 sm:$0xff] }
  0x35   :  { %409 = vmatpush.bf16.msrb.mxu1 %v698_v21  ;;  %384 = vmatpush.bf16.msra.mxu3 %v686_v29 }
  0x38   :  { %397 = vmatpush.bf16.msrb.mxu0 %v626_v30  ;;  %372 = vmatpush.bf16.msra.mxu2 %v614_v37 }
  0x39   :  { %410 = vmatpush.bf16.msrb.mxu1 %v690_v33  ;;  %385 = vmatpush.bf16.msra.mxu3 %v678_v41 }
  0x3c   :  { %398 = vmatpush.bf16.msrb.mxu0 %v618_v42  ;;  %553 = vmatpush.bf16.msrb.mxu2 %v846_v47 }
  0x3d   :  { %411 = vmatpush.bf16.msrb.mxu1 %v682_v45  ;;  %566 = vmatpush.bf16.msrb.mxu3 %v854_v46 }
  0x40   :  { %554 = vmatpush.bf16.msrb.mxu2 %v845_v49 }
  0x41   :  { %567 = vmatpush.bf16.msrb.mxu3 %v853_v48 }
  0x44   :  { %555 = vmatpush.bf16.msrb.mxu2 %v844_v51 }
  0x45   :  { %568 = vmatpush.bf16.msrb.mxu3 %v852_v50 }
  0x48   :  { %556 = vmatpush.bf16.msrb.mxu2 %v843_v53 }
  0x49   :  { %569 = vmatpush.bf16.msrb.mxu3 %v851_v52 }
  0x4c   :  { %557 = vmatpush.bf16.msrb.mxu2 %v842_v5 }
  0x4d   :  { %570 = vmatpush.bf16.msrb.mxu3 %v850_v54 }
  0x50   :  { %558 = vmatpush.bf16.msrb.mxu2 %v841_v7 }
  0x51   :  { %571 = vmatpush.bf16.msrb.mxu3 %v849_v56 }
  0x54   :  { %559 = vmatpush.bf16.msrb.mxu2 %v840_v9 }
  0x55   :  { %572 = vmatpush.bf16.msrb.mxu3 %v848_v6 }
  0x58   :  { %560 = vmatpush.bf16.msrb.mxu2 %v839_v10 }
  0x59   :  { %573 = vmatpush.bf16.msrb.mxu3 %v847_v8 }
  0x9c   :  { %v146_v59 = vpop.f32.mrf.mxu0 }
  0x9d   :  { %v147_v60 = vadd.f32 %v146_v59, %v109_v57 }
  0x9f   :  { %v159_v61 = vpop.f32.mrf.mxu1  ;;  %v163_v63 = vmax.f32 %v147_v60, 0.0 }
  0xa0   :  { %v160_v62 = vadd.f32 %v159_v61, %v110_v58 }
  0xa1   :  { %v165_v1 = vpack.c.bf16 %v163_v63, %v163_v63 }
  0xa2   :  { %v164_v0 = vmax.f32 %v160_v62, 0.0 }
  0xa3   :  { %373 = vmatmul.bf16.vlgmr.msra.gmra.mxu2 %v165_v1  ;;  %399 = vmatmul.bf16.vlgmr.msrb.gmra.mxu0 %v165_v1 }
  0xa4   :  { %v166_v2 = vpack.c.bf16 %v164_v0, %v164_v0  ;;  %v148_v3 = vpop.f32.mrf.mxu0 }
  0xa6   :  { %386 = vmatmul.bf16.vlgmr.msra.gmra.mxu3 %v166_v2  ;;  %412 = vmatmul.bf16.vlgmr.msrb.gmra.mxu1 %v166_v2 }
  0xa7   :  { %v161_v4 = vpop.f32.mrf.mxu1 }
 0x120   :  { %v400_v13 = vpop.f32.mrf.mxu0 }
 0x121   :  { %v401_v14 = vadd.f32 %v400_v13, %v202_v12 }
 0x123   :  { %v413_v15 = vpop.f32.mrf.mxu1 }
 0x124   :  { %v414_v16 = vadd.f32 %v413_v15, %v401_v14 }
 0x126   :  { %v418_v18 = vmax.f32 %v414_v16, 0.0  ;;  %v374_v19 = vpop.f32.mrf.mxu2 }
 0x127   :  { %v375_v21 = vadd.f32 %v374_v19, %v201_v17 }
 0x128   :  { %v420_v20 = vpack.c.bf16 %v418_v18, %v418_v18  ;;  %v402_v23 = vpop.f32.mrf.mxu0 }
 0x129   :  { %v387_v22 = vpop.f32.mrf.mxu3 }
 0x12a   :  { %v388_v24 = vadd.f32 %v387_v22, %v375_v21  ;;  %574 = vmatmul.bf16.vlgmr.msrb.gmra.mxu3 %v420_v20 }
 0x12b   :  { %v415_v25 = vpop.f32.mrf.mxu1 }
 0x12c   :  { %v417_v26 = vmax.f32 %v388_v24, 0.0 }
 0x12e   :  { %v419_v27 = vpack.c.bf16 %v417_v26, %v417_v26  ;;  %v376_v28 = vpop.f32.mrf.mxu2 }
 0x130   :  { %561 = vmatmul.bf16.vlgmr.msrb.gmra.mxu2 %v419_v27 }
 0x131   :  { %v389_v29 = vpop.f32.mrf.mxu3 }
 0x1ad   :  { %v575_v30 = vpop.f32.mrf.mxu3 }
 0x1b3   :  { %v562_v33 = vpop.f32.mrf.mxu2 }
 0x1b4   :  { %v563_v34 = vadd.f32 %v864_v31, %v562_v33 }
 0x1b5   :  { %v577_v36 = vpop.f32.mrf.mxu3 }
 0x1b6   :  { %v576_v37 = vadd.f32 %v575_v30, %v563_v34 }
 0x1b8   :  { %v582_v38 = vmax.f32 %v576_v37, -20.0 }
 0x1ba   :  { %v583_v39 = vmin.f32 %v582_v38, 2.0 }
 0x1bb   :  { %v564_v40 = vpop.f32.mrf.mxu2 }
 0x1bc   :  { %v584_v41 = vsel %vm581_vm1, %v583_v39, %v576_v37 }
 0x1bd   :  { %585 = vst [vmem:[%s1073_s7] sm:$0xff] %v584_v41 }
 0x1be   :  { %590 = vsyncpa [#allocation3], 1 }
 0x1bf   :  { %591 = vsyncpa [#allocation5], 1 }
 0x1c0   :  { %592 = vsyncpa [#allocation8], 1 }

</bundles_post_ra>
